<compile_context>
chip_gen: v7x
topology: tpu7x:2x2x1
jax: 0.10.0
libtpu: 0.0.40
codegen_flags: <defaults>
</compile_context>

<pallas_src>
import math

import jax
import jax.numpy as jnp
from jax.experimental import pallas as pl
from jax.experimental.pallas import tpu as pltpu

_LANES = 128
_SUBLANE_ALIGN = 32          # covers f32 (8), bf16 (16) and int8/bool (32) tiling
_PAD_PRED = 1000.0           # bce(1000, 1) == 0 exactly in f32 (exp(-1000) underflows)
_PAD_LABEL = 1
_MAX_BLOCK_BUDGET = 24 * 1024 * 1024   # bytes of double-buffered input blocks


def _cdiv(a, b):
    return -(-a // b)


def _round_up(a, m):
    return _cdiv(a, m) * m


def _vmem_capacity_bytes():
    try:
        cap = getattr(pltpu.get_tpu_info(), "vmem_capacity_bytes", None)
        if cap:
            return int(cap)
    except Exception:
        pass
    return 64 * 1024 * 1024   # conservative fallback: v7x per-TensorCore VMEM


def _choose_tiling(r_needed, unit, max_rows):
    """Pick (tile_rows, num_tiles). tile_rows is unit-aligned when num_tiles > 1."""
    if r_needed <= unit:
        # Tiny problem: one tile starting at flat offset 0 (no periodicity needed).
        return _round_up(max(r_needed, 1), _SUBLANE_ALIGN), 1
    max_rows_al = max(unit, (max_rows // unit) * unit)
    # Aim for >= 2 tiles so both TensorCores on v7x get work under "parallel".
    half = _round_up(_cdiv(r_needed, 2), unit)
    tile = min(max_rows_al, half)
    return tile, _cdiv(r_needed, tile)


def _multi_task_loss_kernel(pred_ref, label_ref, w_ref, out_ref):
    """One lane-dense tile: writes per-lane partial sums of w * BCE(pred, label)."""
    x = pred_ref[...].astype(jnp.float32)    # (tile_rows, 128), native dtype in HBM
    y = label_ref[...].astype(jnp.float32)   # (tile_rows, 128)
    w = w_ref[...]                           # (tile_rows, 128) f32, VMEM-resident

    # Numerically stable binary_cross_entropy_with_logits (pos_weight=None):
    #   max(x, 0) - x*y + log(1 + exp(-|x|))
    bce = jnp.maximum(x, 0.0) - x * y + jnp.log1p(jnp.exp(-jnp.abs(x)))

    # Sublane (VPU) reduction only; cross-lane reduce + scalar epilogue run once
    # in the wrapper.
    out_ref[...] = jnp.sum(w * bce, axis=0, keepdims=True)[None]   # (1, 1, 128)


def multi_task_loss(cls_scores, label, log_variance, *, loss_weight=1.0,
                    max_tile_rows=None):
    """Pallas implementation of MultiTaskLoss.forward (reduction='mean',
    weight=None, avg_factor=None, pos_weight=None).

    cls_scores: (N, C) logits in native dtype (f32 or bf16).
    label:      (N, C) targets (f32 / bf16 / int8 / bool).
    log_variance: (C,) learnable log-variances.
    max_tile_rows: optional cap on rows-of-128-lanes per tile (testing knob);
                   may be rounded up to keep the class->lane pattern aligned.
    """
    n, c = cls_scores.shape
    assert label.shape == (n, c)
    assert log_variance.shape == (c,)

    if label.dtype == jnp.bool_:
        label = label.astype(jnp.int8)

    total = n * c
    r_needed = _cdiv(total, _LANES)

    # The class->lane weight pattern repeats every P rows of 128 lanes; tiles must
    # be multiples of lcm(32, P) so every tile sees the identical pattern.
    # (Assumes moderate num_classes, e.g. the module default 15.)
    p = c // math.gcd(c, _LANES)
    unit = (_SUBLANE_ALIGN * p) // math.gcd(_SUBLANE_ALIGN, p)

    # VMEM budget: 3 double-buffered (tile_rows, 128) blocks (pred, label, f32 weight).
    per_row_bytes = _LANES * (2 * cls_scores.dtype.itemsize
                              + 2 * label.dtype.itemsize
                              + 2 * 4)
    cap = _vmem_capacity_bytes()
    budget = min(cap // 2, _MAX_BLOCK_BUDGET)
    max_rows = max(_SUBLANE_ALIGN,
                   (budget // per_row_bytes) // _SUBLANE_ALIGN * _SUBLANE_ALIGN)
    if max_tile_rows is not None:
        max_rows = min(max_rows, max(_SUBLANE_ALIGN, int(max_tile_rows)))

    tile_rows, num_tiles = _choose_tiling(r_needed, unit, max_rows)
    if num_tiles > 1:
        assert (tile_rows * _LANES) % c == 0   # identical pattern in every tile
    r_pad = num_tiles * tile_rows              # exact multiple -> no ragged blocks

    # Lane-dense views with a contribution-neutral padded tail (bce == 0 there).
    pad_amt = r_pad * _LANES - total
    flat_pred = cls_scores.reshape(-1)
    flat_label = label.reshape(-1)
    if pad_amt:
        flat_pred = jnp.pad(flat_pred, (0, pad_amt), constant_values=_PAD_PRED)
        flat_label = jnp.pad(flat_label, (0, pad_amt), constant_values=_PAD_LABEL)
    pred2d = flat_pred.reshape(r_pad, _LANES)
    label2d = flat_label.reshape(r_pad, _LANES)

    # Per-element class weight exp(-lv[flat % C]) for one tile; constant block
    # index below keeps it resident in VMEM (no per-tile HBM traffic).
    lv_f32 = log_variance.astype(jnp.float32)
    cls_idx = jnp.arange(tile_rows * _LANES, dtype=jnp.int32) % c
    w_map = jnp.exp(-lv_f32)[cls_idx].reshape(tile_rows, _LANES)

    vmem_limit = int(min(cap - 8 * 1024 * 1024,
                         per_row_bytes * tile_rows + 16 * 1024 * 1024))
    vmem_limit = max(vmem_limit, 16 * 1024 * 1024)

    per_tile = pl.pallas_call(
        _multi_task_loss_kernel,
        out_shape=jax.ShapeDtypeStruct((num_tiles, 1, _LANES), jnp.float32),
        grid_spec=pltpu.PrefetchScalarGridSpec(
            num_scalar_prefetch=0,
            grid=(num_tiles,),
            in_specs=[
                pl.BlockSpec((tile_rows, _LANES), lambda i: (i, 0)),   # pred
                pl.BlockSpec((tile_rows, _LANES), lambda i: (i, 0)),   # label
                pl.BlockSpec((tile_rows, _LANES), lambda i: (0, 0)),   # weight map
            ],
            out_specs=pl.BlockSpec((1, 1, _LANES), lambda i: (i, 0, 0)),
        ),
        compiler_params=pltpu.CompilerParams(
            dimension_semantics=("parallel",),
            vmem_limit_bytes=vmem_limit),
    )(pred2d, label2d, w_map)

    # Tiny epilogue (num_tiles * 128 elements) stays in plain XLA.
    mean_loss = jnp.sum(per_tile) / float(total)   # logical element count
    return loss_weight * (mean_loss + 0.5 * jnp.sum(lv_f32))


def _reference(cls_scores, label, log_variance, loss_weight=1.0):
    x = cls_scores.astype(jnp.float32)
    y = label.astype(jnp.float32)
    lv = log_variance.astype(jnp.float32)
    bce = jnp.maximum(x, 0.0) - x * y + jnp.log1p(jnp.exp(-jnp.abs(x)))
    loss = jnp.mean(jnp.exp(-lv)[None, :] * bce)
    loss = loss + 0.5 * jnp.sum(lv)
    return loss_weight * loss


if __name__ == "__main__":
    key = jax.random.PRNGKey(0)
    ks = jax.random.split(key, 8)

    # Case 1: module defaults (num_classes=15), tiny batch, f32 (single tile).
    n1, c1 = 8, 15
    pred1 = jax.random.normal(ks[0], (n1, c1), dtype=jnp.float32)
    lab1 = (jax.random.uniform(ks[1], (n1, c1)) > 0.5).astype(jnp.float32)
    lv1 = 0.1 * jax.random.normal(ks[2], (c1,), dtype=jnp.float32)
    out1 = jax.block_until_ready(multi_task_loss(pred1, lab1, lv1, loss_weight=1.0))
    ref1 = _reference(pred1, lab1, lv1, 1.0)
    assert jnp.allclose(out1, ref1, rtol=1e-4, atol=1e-5), (out1, ref1)

    # Case 2: bf16 logits + int8 labels, forced small tiles -> 4-step parallel grid.
    n2, c2 = 1024, 16
    pred2 = jax.random.normal(ks[3], (n2, c2), dtype=jnp.float32).astype(jnp.bfloat16)
    lab2 = (jax.random.uniform(ks[4], (n2, c2)) > 0.5).astype(jnp.int8)
    lv2 = 0.1 * jax.random.normal(ks[5], (c2,), dtype=jnp.float32)
    out2 = jax.block_until_ready(
        multi_task_loss(pred2, lab2, lv2, loss_weight=0.7, max_tile_rows=32))
    ref2 = _reference(pred2, lab2, lv2, 0.7)
    assert jnp.allclose(out2, ref2, rtol=1e-4, atol=1e-5), (out2, ref2)

    # Case 3: num_classes=15 multi-tile path — exercises the periodic class->lane
    # weight pattern across tiles plus the padded (bce==0) tail of the last tile.
    n3, c3 = 4200, 15
    pred3 = jax.random.normal(ks[6], (n3, c3), dtype=jnp.float32)
    lab3 = (jax.random.uniform(ks[7], (n3, c3)) > 0.5).astype(jnp.float32)
    out3 = jax.block_until_ready(
        multi_task_loss(pred3, lab3, lv1, loss_weight=1.3, max_tile_rows=480))
    ref3 = _reference(pred3, lab3, lv1, 1.3)
    assert jnp.allclose(out3, ref3, rtol=1e-4, atol=1e-5), (out3, ref3)

    print("KERNEL_OK")
</pallas_src>

<mosaic_0001>
module attributes {stable_mosaic.version = 11 : i64} {
  func.func @_multi_task_loss_kernel(%arg0: i32, %arg1: memref<32x128xf32, #tpu.memory_space<vmem>>, %arg2: memref<32x128xf32, #tpu.memory_space<vmem>>, %arg3: memref<32x128xf32, #tpu.memory_space<vmem>>, %arg4: memref<1x1x128xf32, #tpu.memory_space<vmem>>) attributes {dimension_semantics = [#tpu.dimension_semantics<parallel>], iteration_bounds = array<i64: 1>, scalar_prefetch = 0 : i64, scratch_operands = 0 : i64, tpu.core_type = #tpu.core_type<tc>, window_params = [{transform_indices = @transform_0, window_bounds = array<i64: 32, 128>}, {transform_indices = @transform_1, window_bounds = array<i64: 32, 128>}, {pipeline_mode = #tpu.pipeline_mode<synchronous>, transform_indices = @transform_2, window_bounds = array<i64: 32, 128>}, {transform_indices = @transform_3, window_bounds = array<i64: 1, 1, 128>}]} {
    %c0 = arith.constant 0 : index
    %c0_0 = arith.constant 0 : index
    %0 = vector.load %arg1[%c0, %c0_0] : memref<32x128xf32, #tpu.memory_space<vmem>>, vector<32x128xf32>
    %c0_1 = arith.constant 0 : index
    %c0_2 = arith.constant 0 : index
    %1 = vector.load %arg2[%c0_1, %c0_2] : memref<32x128xf32, #tpu.memory_space<vmem>>, vector<32x128xf32>
    %c0_3 = arith.constant 0 : index
    %c0_4 = arith.constant 0 : index
    %2 = vector.load %arg3[%c0_3, %c0_4] : memref<32x128xf32, #tpu.memory_space<vmem>>, vector<32x128xf32>
    %cst = arith.constant 0.000000e+00 : f32
    %3 = vector.broadcast %cst : f32 to vector<32x128xf32>
    %4 = arith.maximumf %0, %3 : vector<32x128xf32>
    %5 = arith.mulf %0, %1 : vector<32x128xf32>
    %6 = arith.subf %4, %5 : vector<32x128xf32>
    %7 = math.absf %0 : vector<32x128xf32>
    %cst_5 = arith.constant 0.000000e+00 : f32
    %8 = vector.broadcast %cst_5 : f32 to vector<32x128xf32>
    %9 = arith.subf %8, %7 : vector<32x128xf32>
    %10 = math.exp %9 : vector<32x128xf32>
    %11 = math.log1p %10 : vector<32x128xf32>
    %12 = arith.addf %6, %11 : vector<32x128xf32>
    %13 = arith.mulf %2, %12 : vector<32x128xf32>
    %cst_6 = arith.constant dense<0.000000e+00> : vector<128xf32>
    %14 = vector.multi_reduction <add>, %13, %cst_6 [0] : vector<32x128xf32> to vector<128xf32>
    %15 = vector.shape_cast %14 : vector<128xf32> to vector<1x128xf32>
    %16 = vector.shape_cast %15 : vector<1x128xf32> to vector<1x1x128xf32>
    %c0_7 = arith.constant 0 : index
    %c0_8 = arith.constant 0 : index
    %c0_9 = arith.constant 0 : index
    %17 = vector.load %arg4[%c0_7, %c0_8, %c0_9] : memref<1x1x128xf32, #tpu.memory_space<vmem>>, vector<1x1x128xf32>
    tpu.vector_store %arg4[%c0_7, %c0_8, %c0_9], %16 {strides = array<i32>} : memref<1x1x128xf32, #tpu.memory_space<vmem>>, vector<1x1x128xf32>,
    return
  }
  func.func @transform_0(%arg0: i32) -> (i32, i32) {
    %c0_i32 = arith.constant 0 : i32
    %c0_i32_0 = arith.constant 0 : i32
    return %arg0, %c0_i32 : i32, i32
  }
  func.func @transform_1(%arg0: i32) -> (i32, i32) {
    %c0_i32 = arith.constant 0 : i32
    %c0_i32_0 = arith.constant 0 : i32
    return %arg0, %c0_i32 : i32, i32
  }
  func.func @transform_2(%arg0: i32) -> (i32, i32) {
    %c0_i32 = arith.constant 0 : i32
    %c0_i32_0 = arith.constant 0 : i32
    %c0_i32_1 = arith.constant 0 : i32
    return %c0_i32, %c0_i32_0 : i32, i32
  }
  func.func @transform_3(%arg0: i32) -> (i32, i32, i32) {
    %c0_i32 = arith.constant 0 : i32
    %c0_i32_0 = arith.constant 0 : i32
    %c0_i32_1 = arith.constant 0 : i32
    return %arg0, %c0_i32, %c0_i32_0 : i32, i32, i32
  }
}

</mosaic_0001>

<bundles_post_ra>
// kernel: tpu_custom_call.1
= control target key start
LH: loop header
LB: loop body
LE: loop exit
PB: predicated region body
PF: predicated region fallthrough
CT: control target
= control target key end

     0   :  { %8 = vsyncpa [#allocation3], 0  ;;  %s394_s0 = inlined_call_operand.hbm [shape: f32[32,128], index: 0, kind: input, shape index: {}]   ;;  %s395_s1 = inlined_call_operand.hbm [shape: f32[32,128], index: 1, kind: input, shape index: {}]   ;;  %s396_s2 = inlined_call_operand.hbm [shape: f32[32,128], index: 2, kind: input, shape index: {}]   ;;  %s397_s3 = inlined_call_operand.hbm [shape: f32[1,1,128], index: 3, kind: output, shape index: {}]  }
   0x1   :  { %9 = vsyncpa [#allocation6], 0 }
   0x2   :  { %10 = vsyncpa [#allocation4], 0  ;;  %s282_s12 = smov [#allocation5]   ;;  %s283_s14 = smov [#allocation2]  }
   0x3   :  { %s28_s13 = sshll.u32 %s282_s12, 4  ;;  %s16_s15 = sshll.u32 %s283_s14, 4  ;;  %s29_s13 = int_to_ptr.vmem [resolvable:$true] %s28_s13  ;;  %s308_s15 = int_to_ptr.vmem [resolvable:$true] %s16_s15 }
   0x4   :  { %s188_s18 = scalar_lea.hbm %s395_s1, 512 }
   0x5   :  { %p189_p0 = scmp.ne.s32.totalorder %s395_s1, %s188_s18  ;;  %p192_p1 = scmp.lt.u32.totalorder %s188_s18, %s395_s1 }
   0x7   :  { %p194_p2 = pnand %p192_p1, %p189_p0 }
   0x9   :  { %197 = shalt.err (!%p194_p2)
}
   0xa   :  { %s198_s23 = scalar_lea.vmem %s29_s13, 512  ;;  %p203_p4 = scmp.lt.s32.totalorder %s29_s13, %s29_s13 }
   0xb   :  { %p199_p3 = scmp.ne.s32.totalorder %s29_s13, %s198_s23  ;;  %p204_p5 = scmp.lt.s32.totalorder %s198_s23, %s198_s23 }
   0xd   :  { %p205_p6 = por %p204_p5, %p203_p4 }
   0xf   :  { %p206_p7 = pnand %p205_p6, %p199_p3 }
  0x11   :  { %209 = shalt.err (!%p206_p7)
}
  0x12   :  { %s284_s24 = smov 128   ;;  %s285_s25 = smov 8  }
  0x13   :  { %34 = dma.hbm_to_vmem [thread:$0]  %s395_s1, 512, %s29_s13, [#allocation6], %s284_s24, %s284_s24, %s285_s25  }
  0x14   :  { %s210_s30 = scalar_lea.hbm %s394_s0, 512 }
  0x15   :  { %p211_p8 = scmp.ne.s32.totalorder %s394_s0, %s210_s30  ;;  %p214_p9 = scmp.lt.u32.totalorder %s210_s30, %s394_s0 }
  0x17   :  { %p216_p10 = pnand %p214_p9, %p211_p8 }
  0x19   :  { %219 = shalt.err (!%p216_p10)
}
  0x1a   :  { %s220_s8 = scalar_lea.vmem %s308_s15, 512  ;;  %p225_p12 = scmp.lt.s32.totalorder %s308_s15, %s308_s15 }
  0x1b   :  { %p221_p11 = scmp.ne.s32.totalorder %s308_s15, %s220_s8  ;;  %p226_p13 = scmp.lt.s32.totalorder %s220_s8, %s220_s8 }
  0x1d   :  { %p227_p0 = por %p226_p13, %p225_p12 }
  0x1f   :  { %p228_p1 = pnand %p227_p0, %p221_p11 }
  0x21   :  { %231 = shalt.err (!%p228_p1)
}
  0x22   :  { %22 = dma.hbm_to_vmem [thread:$0]  %s394_s0, 512, %s308_s15, [#allocation3], %s284_s24, %s284_s24, %s285_s25  }
  0x23   :  { %s286_s10 = smov [#allocation7]   ;;  %s232_s14 = scalar_lea.hbm %s396_s2, 512 }
  0x24   :  { %s40_s11 = sshll.u32 %s286_s10, 4  ;;  %p233_p2 = scmp.ne.s32.totalorder %s396_s2, %s232_s14  ;;  %s41_s11 = int_to_ptr.vmem [resolvable:$true] %s40_s11 }
  0x25   :  { %p236_p3 = scmp.lt.u32.totalorder %s232_s14, %s396_s2 }
  0x27   :  { %p238_p4 = pnand %p236_p3, %p233_p2 }
  0x29   :  { %241 = shalt.err (!%p238_p4)
}
  0x2a   :  { %s242_s20 = scalar_lea.vmem %s41_s11, 512  ;;  %p247_p6 = scmp.lt.s32.totalorder %s41_s11, %s41_s11 }
  0x2b   :  { %p243_p5 = scmp.ne.s32.totalorder %s41_s11, %s242_s20  ;;  %p248_p7 = scmp.lt.s32.totalorder %s242_s20, %s242_s20 }
  0x2d   :  { %p249_p8 = por %p248_p7, %p247_p6 }
  0x2f   :  { %p250_p9 = pnand %p249_p8, %p243_p5 }
  0x31   :  { %253 = shalt.err (!%p250_p9)
}
  0x32   :  { %46 = dma.hbm_to_vmem [thread:$0]  %s396_s2, 512, %s41_s11, [#allocation6], %s284_s24, %s284_s24, %s285_s25  }
  0x33   :  { %276 = dma.done.wait [#allocation3], 512  }
  0x34   :  { %277 = vsyncadd [#allocation3], 4294966784 }
  0x35   :  { %278 = dma.done.wait [#allocation6], 1024  }
  0x36   :  { %279 = vsyncadd [#allocation6], 4294966272  ;;  %v56_v0 = vld [vmem:[#allocation2] sm:$0xff]  ;;  %v57_v1 = vld [vmem:[#allocation2 + $0x8] sm:$0xff]  ;;  %s287_s2 = smov [#allocation8]  }
  0x37   :  { %v360_v2 = vld [vmem:[#allocation2 + $0x10] sm:$0xff]  ;;  %v362_v3 = vld [vmem:[#allocation2 + $0x18] sm:$0xff]  ;;  %v80_v4 = vand.u32 2147483647, %v56_v0  ;;  %v81_v5 = vand.u32 2147483647, %v57_v1 }
  0x38   :  { %v82_v6 = vand.u32 2147483647, %v360_v2  ;;  %v83_v7 = vand.u32 2147483647, %v362_v3  ;;  %v60_v26 = vld [vmem:[#allocation5] sm:$0xff]  ;;  %v61_v28 = vld [vmem:[#allocation5 + $0x8] sm:$0xff] }
  0x39   :  { %v84_v8 = vsub.f32 0.0, %v80_v4  ;;  %v85_v9 = vsub.f32 0.0, %v81_v5  ;;  %v62_v29 = vld [vmem:[#allocation5 + $0x10] sm:$0xff]  ;;  %v63_v32 = vld [vmem:[#allocation5 + $0x18] sm:$0xff]  ;;  %v68_v33 = vmax.f32 %v56_v0, 0.0  ;;  %v72_v34 = vmul.f32 %v60_v26, %v56_v0  ;;  %v64_v61 = vld [vmem:[#allocation7] sm:$0xff] }
  0x3a   :  { %v86_v10 = vsub.f32 0.0, %v82_v6  ;;  %v87_v11 = vsub.f32 0.0, %v83_v7  ;;  %v69_v37 = vmax.f32 %v57_v1, 0.0  ;;  %v73_v38 = vmul.f32 %v61_v28, %v57_v1  ;;  %v66_v6 = vld [vmem:[#allocation7 + $0x10] sm:$0xff]  ;;  %s156_s21 = sshll.u32 %s287_s2, 4  ;;  %s157_s21 = int_to_ptr.vmem [resolvable:$true] %s156_s21 }
  0x3b   :  { %v88_v12 = vmul.f32 1.442695, %v84_v8  ;;  %v90_v13 = vmul.f32 1.442695, %v85_v9  ;;  %v70_v41 = vmax.f32 %v360_v2, 0.0  ;;  %v74_v42 = vmul.f32 %v62_v29, %v360_v2  ;;  %v65_v2 = vld [vmem:[#allocation7 + $0x8] sm:$0xff]  ;;  %p259_p11 = scmp.lt.s32.totalorder %s157_s21, %s157_s21 }
  0x3c   :  { %v92_v14 = vmul.f32 1.442695, %v86_v10  ;;  %v94_v15 = vmul.f32 1.442695, %v87_v11  ;;  %v71_v44 = vmax.f32 %v362_v3, 0.0  ;;  %v75_v45 = vmul.f32 %v63_v32, %v362_v3  ;;  %s254_s22 = scalar_lea.vmem %s157_s21, 16 }
  0x3d   :  { %172 = vpow2.f32 %v88_v12  ;;  %v76_v49 = vsub.f32 %v68_v33, %v72_v34  ;;  %v77_v54 = vsub.f32 %v69_v37, %v73_v38  ;;  %v78_v59 = vsub.f32 %v70_v41, %v74_v42  ;;  %v67_v12 = vld [vmem:[#allocation7 + $0x18] sm:$0xff]  ;;  %p255_p10 = scmp.ne.s32.totalorder %s157_s21, %s254_s22  ;;  %s258_s23 = scalar_lea.vmem %s157_s21, 32 }
  0x3e   :  { %174 = vpow2.f32 %v90_v13  ;;  %v79_v3 = vsub.f32 %v71_v44, %v75_v45  ;;  %p260_p12 = scmp.lt.s32.totalorder %s258_s23, %s254_s22 }
  0x3f   :  { %176 = vpow2.f32 %v92_v14 }
  0x40   :  { %178 = vpow2.f32 %v94_v15  ;;  %p261_p13 = por %p260_p12, %p259_p11 }
  0x42   :  { %p262_p0 = pnand %p261_p13, %p255_p10 }
  0x47   :  { %v173_v16 = vpop.eup %172 }
  0x48   :  { %v175_v17 = vpop.eup %174  ;;  %v96_v18 = vadd.f32 1.0, %v173_v16  ;;  %v99_v23 = vmul.f32 -0.5, %v173_v16  ;;  %v102_v35 = vand.u32 2147483647, %v173_v16 }
  0x49   :  { %v177_v19 = vpop.eup %176  ;;  %v105_v20 = vadd.f32 1.0, %v175_v17  ;;  %v108_v24 = vmul.f32 -0.5, %v175_v17  ;;  %v111_v39 = vand.u32 2147483647, %v175_v17 }
  0x4a   :  { %v179_v21 = vpop.eup %178  ;;  %180 = vlog2.f32 %v96_v18  ;;  %v114_v22 = vadd.f32 1.0, %v177_v19  ;;  %v117_v27 = vmul.f32 -0.5, %v177_v19  ;;  %v100_v30 = vadd.f32 1.0, %v99_v23 }
  0x4b   :  { %182 = vlog2.f32 %v105_v20  ;;  %v123_v25 = vadd.f32 1.0, %v179_v21  ;;  %v126_v31 = vmul.f32 -0.5, %v179_v21  ;;  %v109_v36 = vadd.f32 1.0, %v108_v24 }
  0x4c   :  { %184 = vlog2.f32 %v114_v22  ;;  %v118_v40 = vadd.f32 1.0, %v117_v27  ;;  %v120_v43 = vand.u32 2147483647, %v177_v19  ;;  %v101_v46 = vmul.f32 %v173_v16, %v100_v30 }
  0x4d   :  { %186 = vlog2.f32 %v123_v25  ;;  %v127_v47 = vadd.f32 1.0, %v126_v31  ;;  %vm370_vm0 = vcmp.lt.f32.partialorder %v102_v35, 0.0004427343  ;;  %v110_v51 = vmul.f32 %v175_v17, %v109_v36 }
  0x4e   :  { %v129_v52 = vand.u32 2147483647, %v179_v21  ;;  %vm374_vm1 = vcmp.lt.f32.partialorder %v111_v39, 0.0004427343  ;;  %v119_v57 = vmul.f32 %v177_v19, %v118_v40  ;;  %vm121_vm2 = vcmp.lt.f32.partialorder %v120_v43, 0.0004427343 }
  0x4f   :  { %v128_v0 = vmul.f32 %v179_v21, %v127_v47 }
  0x50   :  { %vm130_vm3 = vcmp.lt.f32.partialorder %v129_v52, 0.0004427343 }
  0x54   :  { %v181_v48 = vpop.eup %180 }
  0x55   :  { %v183_v53 = vpop.eup %182  ;;  %v98_v55 = vmul.f32 0.6931472, %v181_v48 }
  0x56   :  { %v185_v58 = vpop.eup %184  ;;  %v107_v60 = vmul.f32 0.6931472, %v183_v53 }
  0x57   :  { %v104_v62 = vsel %vm370_vm0, %v101_v46, %v98_v55  ;;  %v116_v63 = vmul.f32 0.6931472, %v185_v58  ;;  %v187_v1 = vpop.eup %186 }
  0x58   :  { %v113_v4 = vsel %vm374_vm1, %v110_v51, %v107_v60  ;;  %v132_v5 = vadd.f32 %v104_v62, %v76_v49  ;;  %v125_v8 = vmul.f32 0.6931472, %v187_v1 }
  0x59   :  { %v122_v7 = vsel %vm121_vm2, %v119_v57, %v116_v63  ;;  %v133_v9 = vadd.f32 %v113_v4, %v77_v54 }
  0x5a   :  { %v134_v10 = vadd.f32 %v122_v7, %v78_v59  ;;  %v136_v11 = vmul.f32 %v132_v5, %v64_v61  ;;  %v131_v13 = vsel %vm130_vm3, %v128_v0, %v125_v8 }
  0x5b   :  { %v137_v14 = vmul.f32 %v133_v9, %v65_v2  ;;  %v135_v15 = vadd.f32 %v131_v13, %v79_v3 }
  0x5c   :  { %v138_v16 = vmul.f32 %v134_v10, %v66_v6 }
  0x5d   :  { %v140_v17 = vadd.f32 %v137_v14, %v136_v11  ;;  %v139_v18 = vmul.f32 %v135_v15, %v67_v12 }
  0x5f   :  { %v141_v19 = vadd.f32 %v140_v17, %v138_v16 }
  0x61   :  { %v142_v20 = vadd.f32 %v141_v19, %v139_v18 }
  0x63   :  { %v143_v21 = vrot.slane %v142_v20, 4 }
  0x65   :  { %v144_v22 = vadd.f32 %v143_v21, %v142_v20 }
  0x67   :  { %v145_v23 = vrot.slane %v144_v22, 2 }
  0x69   :  { %v146_v24 = vadd.f32 %v145_v23, %v144_v22 }
  0x6b   :  { %v147_v25 = vrot.slane %v146_v24, 1 }
  0x6d   :  { %v148_v26 = vadd.f32 %v147_v25, %v146_v24 }
  0x6f   :  { %149 = vst [vmem:[#allocation8] sm:$0x1] %v148_v26 }
  0x70   :  { %265 = shalt.err (!%p262_p0)
}
  0x71   :  { %s266_s26 = scalar_lea.hbm %s397_s3, 16 }
  0x72   :  { %p267_p1 = scmp.ne.s32.totalorder %s397_s3, %s266_s26  ;;  %p270_p2 = scmp.lt.u32.totalorder %s266_s26, %s397_s3 }
  0x74   :  { %p272_p3 = pnand %p270_p2, %p267_p1 }
  0x76   :  { %275 = shalt.err (!%p272_p3)
}
  0x77   :  { %159 = dma.vmem_to_hbm [thread:$0]  %s157_s21, 16, %s397_s3, [#allocation4]  }
  0x78   :  { %280 = dma.done.wait [#allocation4], 16  }
  0x79   :  { %281 = vsyncadd [#allocation4], 4294967280 }
  0x7a   :  { %163 = vsyncpa [#allocation3], 1 }
  0x7b   :  { %164 = vsyncpa [#allocation6], 1 }
  0x7c   :  { %165 = vsyncpa [#allocation4], 1 }

</bundles_post_ra>
